<compile_context>
chip_gen: v7x
topology: tpu7x:2x2x1
jax: 0.10.0
libtpu: 0.0.40
codegen_flags: <defaults>
</compile_context>

<pallas_src>
import jax
import jax.numpy as jnp
from jax import lax
from jax.experimental import pallas as pl
from jax.experimental.pallas import tpu as pltpu


_ACC_ROWS = 32  # rows of the resident per-chunk accumulator slab (independent add chains)


def _make_kernel(n_valid_rows: int, tile_rows: int, tiles_per_chunk: int):
    def kernel(x_ref, y_ref, out_ref):
        c = pl.program_id(0)  # outer "parallel" chunk axis (megacore split on 2-TC chips)
        i = pl.program_id(1)  # inner "arbitrary" reduction axis

        @pl.when(i == 0)
        def _():
            out_ref[...] = jnp.zeros_like(out_ref)

        x = x_ref[...].astype(jnp.float32)
        y = y_ref[...].astype(jnp.float32)
        # two clean EUP log pushes per element; matches F.l1_loss(log(y), log(x)) exactly
        diff = jnp.abs(jnp.log(y) - jnp.log(x))

        acc_rows = out_ref.shape[0]
        lanes = diff.shape[-1]
        row_start = (c * tiles_per_chunk + i) * tile_rows
        is_full = row_start + tile_rows <= n_valid_rows

        @pl.when(is_full)
        def _():
            out_ref[...] += diff.reshape(-1, acc_rows, lanes).sum(axis=0)

        @pl.when(jnp.logical_not(is_full))
        def _():
            # ragged tail: zero out-of-range rows BEFORE accumulating.  Use where, not
            # multiply: OOB rows hold unspecified data -> log can give NaN/Inf.
            row_ids = row_start + lax.broadcasted_iota(jnp.int32, (tile_rows, 1), 0)
            masked = jnp.where(row_ids < n_valid_rows, diff, 0.0)
            out_ref[...] += masked.reshape(-1, acc_rows, lanes).sum(axis=0)

    return kernel


def _n_chunks_for_megacore(tiles_total: int) -> int:
    """2-way 'parallel' chunk split only on 2-TensorCore chips and only when it splits evenly."""
    if tiles_total < 2 or tiles_total % 2 != 0:
        return 1
    try:
        kind = jax.devices()[0].device_kind.lower()
    except Exception:
        return 1
    # v5e / v6e are single-TC: a parallel outer axis there is just a serial loop plus an
    # extra accumulator slab.  Only TPU7x-class chips have 2 TensorCores per chip.
    return 2 if "7" in kind else 1


def log_stft_magnitude_loss(x_mag: jax.Array, y_mag: jax.Array) -> jax.Array:
    """Pallas TPU implementation of LogSTFTMagnitudeLoss.forward.

    x_mag, y_mag: (B, #frames, #freq_bins) positive magnitudes (any float dtype).
    Returns a float32 scalar == F.l1_loss(log(y_mag), log(x_mag)) (mean reduction).
    """
    assert x_mag.shape == y_mag.shape
    B, T, F = x_mag.shape
    n_elems = B * T * F
    itemsize = max(jnp.dtype(x_mag.dtype).itemsize, jnp.dtype(y_mag.dtype).itemsize)

    # --- layout: lane-dense flattened view when possible (free reshape, no data movement) ---
    if n_elems % 128 == 0:
        lane_w = 128
        for w in (1024, 512, 256):
            if n_elems % w == 0 and n_elems // w >= _ACC_ROWS:
                lane_w = w
                break
        n_rows = n_elems // lane_w
    else:
        lane_w = F
        n_rows = B * T
    x2 = x_mag.reshape(n_rows, lane_w)
    y2 = y_mag.reshape(n_rows, lane_w)

    # --- tile sizing: per-input block <= ~2 MiB so 2 inputs x 2 pipeline buffers <= 8 MiB ---
    if n_rows >= _ACC_ROWS:
        acc_rows = _ACC_ROWS
        budget_rows = max(
            _ACC_ROWS,
            (2 * 1024 * 1024 // (lane_w * itemsize)) // _ACC_ROWS * _ACC_ROWS,
        )
        # never exceed the array's row count (tail is masked in-kernel, not padded)
        tile_rows = min(4096, budget_rows, (n_rows // _ACC_ROWS) * _ACC_ROWS)
    else:
        # tiny input: single full-extent block (block dims == array dims is always legal)
        acc_rows = n_rows
        tile_rows = n_rows

    tiles_total = (n_rows + tile_rows - 1) // tile_rows
    n_chunks = _n_chunks_for_megacore(tiles_total)
    tiles_per_chunk = tiles_total // n_chunks  # exact (n_chunks==2 only when tiles_total even)

    kernel = _make_kernel(n_rows, tile_rows, tiles_per_chunk)

    partials = pl.pallas_call(
        kernel,
        out_shape=jax.ShapeDtypeStruct((n_chunks * acc_rows, lane_w), jnp.float32),
        grid_spec=pltpu.PrefetchScalarGridSpec(
            num_scalar_prefetch=0,
            grid=(n_chunks, tiles_per_chunk),
            in_specs=[
                pl.BlockSpec((tile_rows, lane_w), lambda c, i: (c * tiles_per_chunk + i, 0)),
                pl.BlockSpec((tile_rows, lane_w), lambda c, i: (c * tiles_per_chunk + i, 0)),
            ],
            # per-chunk (acc_rows, lane_w) f32 partial-sum slab, resident across the inner axis
            out_specs=pl.BlockSpec((acc_rows, lane_w), lambda c, i: (c, 0)),
        ),
        compiler_params=pltpu.CompilerParams(
            dimension_semantics=("parallel", "arbitrary"),
            vmem_limit_bytes=32 * 1024 * 1024,
        ),
        cost_estimate=pl.CostEstimate(
            flops=3 * n_elems,
            transcendentals=2 * n_elems,
            bytes_accessed=2 * n_elems * itemsize + n_chunks * acc_rows * lane_w * 4,
        ),
    )(x2, y2)

    # single tiny cross-lane/sublane reduce + mean, done exactly once outside the kernel
    return jnp.sum(partials) / jnp.float32(n_elems)


if __name__ == "__main__":
    key = jax.random.PRNGKey(0)
    kx, ky = jax.random.split(key)

    def _ref(x, y):
        xf = x.astype(jnp.float32)
        yf = y.astype(jnp.float32)
        return jnp.mean(jnp.abs(jnp.log(yf) - jnp.log(xf)))

    # primary shape (batch, #frames, #freq_bins); magnitudes strictly positive for log
    B, T, F = 2, 16, 128
    x_mag = jax.random.uniform(kx, (B, T, F), jnp.float32, minval=0.1, maxval=4.0)
    y_mag = jax.random.uniform(ky, (B, T, F), jnp.float32, minval=0.1, maxval=4.0)
    loss = jax.block_until_ready(log_stft_magnitude_loss(x_mag, y_mag))
    assert jnp.allclose(loss, _ref(x_mag, y_mag), rtol=1e-5, atol=1e-6), (loss, _ref(x_mag, y_mag))

    # ragged shape: rows not a multiple of 8/32, freq bins not a multiple of 128
    B2, T2, F2 = 2, 13, 80
    x_r = jax.random.uniform(kx, (B2, T2, F2), jnp.float32, minval=0.1, maxval=4.0)
    y_r = jax.random.uniform(ky, (B2, T2, F2), jnp.float32, minval=0.1, maxval=4.0)
    loss_r = jax.block_until_ready(log_stft_magnitude_loss(x_r, y_r))
    assert jnp.allclose(loss_r, _ref(x_r, y_r), rtol=1e-5, atol=1e-6), (loss_r, _ref(x_r, y_r))

    # realistic STFT bin count (257), exercises the in-kernel row-tail masking path
    B3, T3, F3 = 3, 37, 257
    x_s = jax.random.uniform(kx, (B3, T3, F3), jnp.float32, minval=0.1, maxval=4.0)
    y_s = jax.random.uniform(ky, (B3, T3, F3), jnp.float32, minval=0.1, maxval=4.0)
    loss_s = jax.block_until_ready(log_stft_magnitude_loss(x_s, y_s))
    assert jnp.allclose(loss_s, _ref(x_s, y_s), rtol=1e-5, atol=1e-6), (loss_s, _ref(x_s, y_s))

    # bf16 inputs, lane-dense flattened path
    B4, T4, F4 = 4, 24, 128
    x_b = jax.random.uniform(kx, (B4, T4, F4), jnp.float32, minval=0.1, maxval=4.0).astype(jnp.bfloat16)
    y_b = jax.random.uniform(ky, (B4, T4, F4), jnp.float32, minval=0.1, maxval=4.0).astype(jnp.bfloat16)
    loss_b = jax.block_until_ready(log_stft_magnitude_loss(x_b, y_b))
    assert jnp.allclose(loss_b, _ref(x_b, y_b), rtol=1e-4, atol=1e-5), (loss_b, _ref(x_b, y_b))

    print("KERNEL_OK")
</pallas_src>

<mosaic_0001>
module attributes {stable_mosaic.version = 11 : i64} {
  func.func @kernel(%arg0: i32, %arg1: i32, %arg2: memref<32x128xf32, #tpu.memory_space<vmem>>, %arg3: memref<32x128xf32, #tpu.memory_space<vmem>>, %arg4: memref<32x128xf32, #tpu.memory_space<vmem>>) attributes {dimension_semantics = [#tpu.dimension_semantics<parallel>, #tpu.dimension_semantics<arbitrary>], iteration_bounds = array<i64: 1, 1>, scalar_prefetch = 0 : i64, scratch_operands = 0 : i64, tpu.core_type = #tpu.core_type<tc>, window_params = [{transform_indices = @transform_0, window_bounds = array<i64: 32, 128>}, {transform_indices = @transform_1, window_bounds = array<i64: 32, 128>}, {transform_indices = @transform_2, window_bounds = array<i64: 32, 128>}]} {
    %c0_i32 = arith.constant 0 : i32
    %0 = arith.cmpi eq, %arg1, %c0_i32 : i32
    %1 = arith.extui %0 : i1 to i32
    %c0_i32_0 = arith.constant 0 : i32
    %2 = arith.cmpi ne, %1, %c0_i32_0 : i32
    scf.if %2 {
      %cst = arith.constant 0.000000e+00 : f32
      %19 = vector.broadcast %cst : f32 to vector<32x128xf32>
      %c0_8 = arith.constant 0 : index
      %c0_9 = arith.constant 0 : index
      %20 = vector.load %arg4[%c0_8, %c0_9] : memref<32x128xf32, #tpu.memory_space<vmem>>, vector<32x128xf32>
      tpu.vector_store %arg4[%c0_8, %c0_9], %19 {strides = array<i32>} : memref<32x128xf32, #tpu.memory_space<vmem>>, vector<32x128xf32>,
    } else {
    }
    %c0 = arith.constant 0 : index
    %c0_1 = arith.constant 0 : index
    %3 = vector.load %arg2[%c0, %c0_1] : memref<32x128xf32, #tpu.memory_space<vmem>>, vector<32x128xf32>
    %c0_2 = arith.constant 0 : index
    %c0_3 = arith.constant 0 : index
    %4 = vector.load %arg3[%c0_2, %c0_3] : memref<32x128xf32, #tpu.memory_space<vmem>>, vector<32x128xf32>
    %5 = math.log %4 : vector<32x128xf32>
    %6 = math.log %3 : vector<32x128xf32>
    %7 = arith.subf %5, %6 : vector<32x128xf32>
    %8 = math.absf %7 : vector<32x128xf32>
    %c1_i32 = arith.constant 1 : i32
    %9 = arith.muli %arg0, %c1_i32 : i32
    %10 = arith.addi %9, %arg1 : i32
    %c32_i32 = arith.constant 32 : i32
    %11 = arith.muli %10, %c32_i32 : i32
    %c32_i32_4 = arith.constant 32 : i32
    %12 = arith.addi %11, %c32_i32_4 : i32
    %c32_i32_5 = arith.constant 32 : i32
    %13 = arith.cmpi sle, %12, %c32_i32_5 : i32
    %14 = arith.extui %13 : i1 to i32
    %c0_i32_6 = arith.constant 0 : i32
    %15 = arith.cmpi ne, %14, %c0_i32_6 : i32
    scf.if %15 {
      %c0_8 = arith.constant 0 : index
      %c0_9 = arith.constant 0 : index
      %19 = vector.load %arg4[%c0_8, %c0_9] : memref<32x128xf32, #tpu.memory_space<vmem>>, vector<32x128xf32>
      %20 = vector.shape_cast %8 : vector<32x128xf32> to vector<1x32x128xf32>
      %cst = arith.constant dense<0.000000e+00> : vector<32x128xf32>
      %21 = vector.multi_reduction <add>, %20, %cst [0] : vector<1x32x128xf32> to vector<32x128xf32>
      %22 = arith.addf %19, %21 : vector<32x128xf32>
      %c0_10 = arith.constant 0 : index
      %c0_11 = arith.constant 0 : index
      %23 = vector.load %arg4[%c0_10, %c0_11] : memref<32x128xf32, #tpu.memory_space<vmem>>, vector<32x128xf32>
      tpu.vector_store %arg4[%c0_10, %c0_11], %22 {strides = array<i32>} : memref<32x128xf32, #tpu.memory_space<vmem>>, vector<32x128xf32>,
    } else {
    }
    %true = arith.constant true
    %16 = arith.xori %13, %true : i1
    %17 = arith.extui %16 : i1 to i32
    %c0_i32_7 = arith.constant 0 : i32
    %18 = arith.cmpi ne, %17, %c0_i32_7 : i32
    scf.if %18 {
      %19 = tpu.iota {dimensions = array<i32: 0>} : vector<32x1xi32>
      %20 = vector.broadcast %11 : i32 to vector<32x1xi32>
      %21 = arith.addi %20, %19 : vector<32x1xi32>
      %c32_i32_8 = arith.constant 32 : i32
      %22 = vector.broadcast %c32_i32_8 : i32 to vector<32x1xi32>
      %23 = arith.cmpi slt, %21, %22 : vector<32x1xi32>
      %cst = arith.constant 0.000000e+00 : f32
      %24 = vector.shape_cast %23 : vector<32x1xi1> to vector<32x1xi1>
      %25 = vector.broadcast %24 : vector<32x1xi1> to vector<32x128xi1>
      %26 = vector.broadcast %cst : f32 to vector<32x128xf32>
      %27 = arith.select %25, %8, %26 : vector<32x128xi1>, vector<32x128xf32>
      %c0_9 = arith.constant 0 : index
      %c0_10 = arith.constant 0 : index
      %28 = vector.load %arg4[%c0_9, %c0_10] : memref<32x128xf32, #tpu.memory_space<vmem>>, vector<32x128xf32>
      %29 = vector.shape_cast %27 : vector<32x128xf32> to vector<1x32x128xf32>
      %cst_11 = arith.constant dense<0.000000e+00> : vector<32x128xf32>
      %30 = vector.multi_reduction <add>, %29, %cst_11 [0] : vector<1x32x128xf32> to vector<32x128xf32>
      %31 = arith.addf %28, %30 : vector<32x128xf32>
      %c0_12 = arith.constant 0 : index
      %c0_13 = arith.constant 0 : index
      %32 = vector.load %arg4[%c0_12, %c0_13] : memref<32x128xf32, #tpu.memory_space<vmem>>, vector<32x128xf32>
      tpu.vector_store %arg4[%c0_12, %c0_13], %31 {strides = array<i32>} : memref<32x128xf32, #tpu.memory_space<vmem>>, vector<32x128xf32>,
    } else {
    }
    return
  }
  func.func @transform_0(%arg0: i32, %arg1: i32) -> (i32, i32) {
    %c1_i32 = arith.constant 1 : i32
    %0 = arith.muli %arg0, %c1_i32 : i32
    %1 = arith.addi %0, %arg1 : i32
    %c0_i32 = arith.constant 0 : i32
    %c0_i32_0 = arith.constant 0 : i32
    return %1, %c0_i32 : i32, i32
  }
  func.func @transform_1(%arg0: i32, %arg1: i32) -> (i32, i32) {
    %c1_i32 = arith.constant 1 : i32
    %0 = arith.muli %arg0, %c1_i32 : i32
    %1 = arith.addi %0, %arg1 : i32
    %c0_i32 = arith.constant 0 : i32
    %c0_i32_0 = arith.constant 0 : i32
    return %1, %c0_i32 : i32, i32
  }
  func.func @transform_2(%arg0: i32, %arg1: i32) -> (i32, i32) {
    %c0_i32 = arith.constant 0 : i32
    %c0_i32_0 = arith.constant 0 : i32
    return %arg0, %c0_i32 : i32, i32
  }
}

</mosaic_0001>

<bundles_post_ra>
// kernel: tpu_custom_call.1
= control target key start
LH: loop header
LB: loop body
LE: loop exit
PB: predicated region body
PF: predicated region fallthrough
CT: control target
= control target key end

     0   :  { %7 = vsyncpa [#allocation3], 0  ;;  %s338_s0 = inlined_call_operand.hbm [shape: f32[32,128], index: 0, kind: input, shape index: {}]   ;;  %s339_s1 = inlined_call_operand.hbm [shape: f32[32,128], index: 1, kind: input, shape index: {}]   ;;  %s340_s2 = inlined_call_operand.hbm [shape: f32[32,128], index: 2, kind: output, shape index: {}]  }
   0x1   :  { %8 = vsyncpa [#allocation6], 0 }
   0x2   :  { %9 = vsyncpa [#allocation4], 0  ;;  %s273_s9 = smov [#allocation2]   ;;  %s201_s13 = scalar_lea.hbm %s338_s0, 512 }
   0x3   :  { %s19_s10 = sshll.u32 %s273_s9, 4  ;;  %p202_p0 = scmp.ne.s32.totalorder %s338_s0, %s201_s13  ;;  %s20_s10 = int_to_ptr.vmem [resolvable:$true] %s19_s10 }
   0x4   :  { %p205_p1 = scmp.lt.u32.totalorder %s201_s13, %s338_s0 }
   0x6   :  { %p207_p2 = pnand %p205_p1, %p202_p0 }
   0x8   :  { %210 = shalt.err (!%p207_p2)
}
   0x9   :  { %s211_s18 = scalar_lea.vmem %s20_s10, 512  ;;  %p216_p4 = scmp.lt.s32.totalorder %s20_s10, %s20_s10 }
   0xa   :  { %p212_p3 = scmp.ne.s32.totalorder %s20_s10, %s211_s18  ;;  %p217_p5 = scmp.lt.s32.totalorder %s211_s18, %s211_s18 }
   0xc   :  { %p218_p6 = por %p217_p5, %p216_p4 }
   0xe   :  { %p219_p7 = pnand %p218_p6, %p212_p3 }
  0x10   :  { %222 = shalt.err (!%p219_p7)
}
  0x11   :  { %s274_s19 = smov 128   ;;  %s275_s20 = smov 8  }
  0x12   :  { %25 = dma.hbm_to_vmem [thread:$0]  %s338_s0, 512, %s20_s10, [#allocation3], %s274_s19, %s274_s19, %s275_s20  }
  0x13   :  { %s276_s23 = smov [#allocation5]   ;;  %s223_s27 = scalar_lea.hbm %s339_s1, 512 }
  0x14   :  { %s35_s24 = sshll.u32 %s276_s23, 4  ;;  %p224_p8 = scmp.ne.s32.totalorder %s339_s1, %s223_s27  ;;  %s36_s24 = int_to_ptr.vmem [resolvable:$true] %s35_s24 }
  0x15   :  { %p227_p9 = scmp.lt.u32.totalorder %s223_s27, %s339_s1 }
  0x17   :  { %p229_p10 = pnand %p227_p9, %p224_p8 }
  0x19   :  { %232 = shalt.err (!%p229_p10)
}
  0x1a   :  { %s233_s4 = scalar_lea.vmem %s36_s24, 512  ;;  %p238_p12 = scmp.lt.s32.totalorder %s36_s24, %s36_s24 }
  0x1b   :  { %p234_p11 = scmp.ne.s32.totalorder %s36_s24, %s233_s4  ;;  %p239_p13 = scmp.lt.s32.totalorder %s233_s4, %s233_s4 }
  0x1d   :  { %p240_p0 = por %p239_p13, %p238_p12 }
  0x1f   :  { %p241_p1 = pnand %p240_p0, %p234_p11 }
  0x21   :  { %244 = shalt.err (!%p241_p1)
}
  0x22   :  { %41 = dma.hbm_to_vmem [thread:$0]  %s339_s1, 512, %s36_s24, [#allocation6], %s274_s19, %s274_s19, %s275_s20  }
  0x23   :  { %267 = dma.done.wait [#allocation3], 512  }
  0x24   :  { %268 = vsyncadd [#allocation3], 4294966784 }
  0x25   :  { %269 = dma.done.wait [#allocation6], 512  }
  0x26   :  { %270 = vsyncadd [#allocation6], 4294966784  ;;  %v60_v0 = vld [vmem:[#allocation2] sm:$0xff]  ;;  %v61_v2 = vld [vmem:[#allocation2 + $0x8] sm:$0xff]  ;;  %s277_s1 = smov [#allocation7]  }
  0x27   :  { %v64_v1 = vld [vmem:[#allocation5] sm:$0xff]  ;;  %v65_v3 = vld [vmem:[#allocation5 + $0x8] sm:$0xff]  ;;  %v66_v4 = vld [vmem:[#allocation5 + $0x10] sm:$0xff]  ;;  %s166_s6 = sshll.u32 %s277_s1, 4  ;;  %s167_s6 = int_to_ptr.vmem [resolvable:$true] %s166_s6 }
  0x28   :  { %185 = vlog2.f32 %v64_v1  ;;  %v62_v5 = vld [vmem:[#allocation2 + $0x10] sm:$0xff]  ;;  %v67_v6 = vld [vmem:[#allocation5 + $0x18] sm:$0xff]  ;;  %s245_s7 = scalar_lea.vmem %s167_s6, 512  ;;  %p250_p3 = scmp.lt.s32.totalorder %s167_s6, %s167_s6 }
  0x29   :  { %187 = vlog2.f32 %v60_v0  ;;  %v63_v7 = vld [vmem:[#allocation2 + $0x18] sm:$0xff]  ;;  %p246_p2 = scmp.ne.s32.totalorder %s167_s6, %s245_s7  ;;  %p251_p4 = scmp.lt.s32.totalorder %s245_s7, %s245_s7 }
  0x2a   :  { %189 = vlog2.f32 %v65_v3 }
  0x2b   :  { %191 = vlog2.f32 %v61_v2  ;;  %p252_p5 = por %p251_p4, %p250_p3 }
  0x2c   :  { %193 = vlog2.f32 %v66_v4 }
  0x2d   :  { %195 = vlog2.f32 %v62_v5  ;;  %p253_p6 = pnand %p252_p5, %p246_p2 }
  0x2e   :  { %197 = vlog2.f32 %v67_v6 }
  0x2f   :  { %199 = vlog2.f32 %v63_v7 }
  0x32   :  { %v186_v8 = vpop.eup %185 }
  0x33   :  { %v188_v9 = vpop.eup %187  ;;  %v69_v10 = vmul.f32 0.6931472, %v186_v8 }
  0x34   :  { %v190_v11 = vpop.eup %189  ;;  %v77_v12 = vmul.f32 0.6931472, %v188_v9 }
  0x35   :  { %v192_v13 = vpop.eup %191  ;;  %v71_v14 = vmul.f32 0.6931472, %v190_v11 }
  0x36   :  { %v194_v15 = vpop.eup %193  ;;  %v84_v16 = vsub.f32 %v69_v10, %v77_v12  ;;  %v79_v17 = vmul.f32 0.6931472, %v192_v13 }
  0x37   :  { %v196_v18 = vpop.eup %195  ;;  %v73_v19 = vmul.f32 0.6931472, %v194_v15 }
  0x38   :  { %v198_v20 = vpop.eup %197  ;;  %v88_v21 = vand.u32 2147483647, %v84_v16  ;;  %v85_v22 = vsub.f32 %v71_v14, %v79_v17  ;;  %v81_v23 = vmul.f32 0.6931472, %v196_v18 }
  0x39   :  { %v200_v24 = vpop.eup %199  ;;  %v75_v25 = vmul.f32 0.6931472, %v198_v20 }
  0x3a   :  { %v89_v26 = vand.u32 2147483647, %v85_v22  ;;  %v86_v27 = vsub.f32 %v73_v19, %v81_v23  ;;  %v83_v28 = vmul.f32 0.6931472, %v200_v24  ;;  %111 = vst [vmem:[#allocation7] sm:$0xff] %v88_v21 }
  0x3c   :  { %v90_v29 = vand.u32 2147483647, %v86_v27  ;;  %v87_v30 = vsub.f32 %v75_v25, %v83_v28  ;;  %112 = vst [vmem:[#allocation7 + $0x8] sm:$0xff] %v89_v26 }
  0x3e   :  { %v91_v31 = vand.u32 2147483647, %v87_v30  ;;  %113 = vst [vmem:[#allocation7 + $0x10] sm:$0xff] %v90_v29 }
  0x40   :  { %114 = vst [vmem:[#allocation7 + $0x18] sm:$0xff] %v91_v31 }
  0x41   :  { %256 = shalt.err (!%p253_p6)
}
  0x42   :  { %s257_s10 = scalar_lea.hbm %s340_s2, 512 }
  0x43   :  { %p258_p7 = scmp.ne.s32.totalorder %s340_s2, %s257_s10  ;;  %p261_p8 = scmp.lt.u32.totalorder %s257_s10, %s340_s2 }
  0x45   :  { %p263_p9 = pnand %p261_p8, %p258_p7 }
  0x47   :  { %266 = shalt.err (!%p263_p9)
}
  0x48   :  { %172 = dma.vmem_to_hbm [thread:$0]  %s167_s6, 512, %s340_s2, [#allocation4], %s274_s19, %s274_s19, %s275_s20  }
  0x49   :  { %271 = dma.done.wait [#allocation4], 512  }
  0x4a   :  { %272 = vsyncadd [#allocation4], 4294966784 }
  0x4b   :  { %176 = vsyncpa [#allocation3], 1 }
  0x4c   :  { %177 = vsyncpa [#allocation6], 1 }
  0x4d   :  { %178 = vsyncpa [#allocation4], 1 }

</bundles_post_ra>
